<compile_context>
chip_gen: v6e
topology: v6e:2x2x1
jax: 0.10.0
libtpu: 0.0.40
codegen_flags: <defaults>
</compile_context>

<pallas_src>
import functools

import jax
import jax.numpy as jnp
from jax.experimental import pallas as pl
from jax.experimental.pallas import tpu as pltpu


_LANE = 512                        # lane-dense width: large multiple of 128
_MAX_TILE_BYTES = 2 * 1024 * 1024  # ~2 MiB/array/tile: safe on v5e/v6e/v7x


def _round_up(x, m):
    return ((x + m - 1) // m) * m


def _apply_kernel(fcn, n_in, *refs):
    """Load each input tile, apply fcn on-chip, store the result tile."""
    in_refs = refs[:n_in]
    out_ref = refs[n_in]
    vals = tuple(r[...] for r in in_refs)
    result = fcn(*vals)
    if result.dtype != out_ref.dtype:   # avoid a no-op astype copy
        result = result.astype(out_ref.dtype)
    out_ref[...] = result


def pallas_apply(fcn, *inputs):
    """Apply an elementwise, shape-preserving fcn to same-shaped inputs."""
    x0 = inputs[0]
    orig_shape = x0.shape
    if not all(inp.shape == orig_shape for inp in inputs):
        raise ValueError(
            "pallas FunctionModel supports same-shaped inputs only")

    # Trace-time guards: fcn must return a single, shape-preserving array.
    out_struct = jax.eval_shape(fcn, *inputs)
    if not isinstance(out_struct, jax.ShapeDtypeStruct):
        raise ValueError(
            "pallas FunctionModel requires fcn to return a single array")
    if out_struct.shape != orig_shape:
        raise ValueError(
            "pallas FunctionModel requires an elementwise (shape-preserving) "
            f"fcn; got output shape {out_struct.shape} for input {orig_shape}")
    out_dtype = out_struct.dtype

    total = 1
    for d in orig_shape:
        total *= d

    # ---- lane-dense 2D tiling ------------------------------------------------
    itemsize = max(
        max(jnp.dtype(inp.dtype).itemsize for inp in inputs),
        jnp.dtype(out_dtype).itemsize,
    )
    lane = _LANE
    # Rows of the flattened (M, lane) view, padded to a sublane multiple (8).
    rows_needed = _round_up(-(-total // lane), 8)
    # Rows per tile: cap tile bytes, keep a multiple of 8.
    tm_cap = max(8, (_MAX_TILE_BYTES // (lane * itemsize)) // 8 * 8)
    tm = min(tm_cap, rows_needed)
    # Pad row count to a multiple of the tile so every block is full-sized
    # (no masked partial stores on the last block).
    m_rows = _round_up(rows_needed, tm)
    padded_total = m_rows * lane
    grid = (m_rows // tm,)

    def _to_lane_dense(a):
        flat = a.reshape(-1)
        pad = padded_total - total
        if pad:
            # Zero padding is sliced away after the kernel; it never reaches
            # the user-visible output.
            flat = jnp.pad(flat, (0, pad))
        return flat.reshape(m_rows, lane)

    flat_inputs = tuple(_to_lane_dense(inp) for inp in inputs)

    n_in = len(inputs)
    kernel = functools.partial(_apply_kernel, fcn, n_in)

    tile_spec = pl.BlockSpec((tm, lane), lambda i: (i, 0))

    out_flat = pl.pallas_call(
        kernel,
        out_shape=jax.ShapeDtypeStruct((m_rows, lane), out_dtype),
        grid_spec=pltpu.PrefetchScalarGridSpec(
            num_scalar_prefetch=0,
            grid=grid,
            in_specs=[tile_spec] * n_in,
            out_specs=tile_spec,
        ),
        compiler_params=pltpu.CompilerParams(
            dimension_semantics=("parallel",),
            # Big tiles need headroom above the default scoped VMEM limit on
            # v5e (16 MiB) / v6e (32 MiB); 48 MiB still leaves slack under
            # v7x's 64 MiB physical VMEM.
            vmem_limit_bytes=48 * 1024 * 1024,
        ),
    )(*flat_inputs)

    return out_flat.reshape(-1)[:total].reshape(orig_shape)


class FunctionModel:
    """JAX/Pallas port of xraysyn.utils.torch.FunctionModel."""

    def __init__(self, fcn):
        self.fcn = fcn

    def __call__(self, *inputs):
        return pallas_apply(self.fcn, *inputs)

    # Match nn.Module's forward() name.
    forward = __call__


if __name__ == "__main__":
    key = jax.random.PRNGKey(0)
    kx, ky = jax.random.split(key)

    # Small NCHW inputs consistent with the module's typical usage.
    x = jax.random.normal(kx, (2, 4, 16, 16), dtype=jnp.float32)
    y = jax.random.normal(ky, (2, 4, 16, 16), dtype=jnp.float32)

    # The wrapped function: an elementwise tensor expression.
    fcn = lambda a, b: jnp.tanh(a) * b + a

    model = FunctionModel(fcn)
    out = model(x, y)
    out = jax.block_until_ready(out)

    # Sanity check against the plain-JAX reference (same semantics as
    # FunctionModel.forward in PyTorch: just fcn(*inputs)).
    ref = fcn(x, y)
    assert out.shape == ref.shape and out.dtype == ref.dtype
    assert jnp.max(jnp.abs(out - ref)) < 1e-5

    print("KERNEL_OK")
</pallas_src>

<mosaic_0001>
module attributes {stable_mosaic.version = 11 : i64} {
  func.func @_apply_kernel(%arg0: i32, %arg1: memref<8x512xf32, #tpu.memory_space<vmem>>, %arg2: memref<8x512xf32, #tpu.memory_space<vmem>>, %arg3: memref<8x512xf32, #tpu.memory_space<vmem>>) attributes {dimension_semantics = [#tpu.dimension_semantics<parallel>], iteration_bounds = array<i64: 1>, scalar_prefetch = 0 : i64, scratch_operands = 0 : i64, tpu.core_type = #tpu.core_type<tc>, window_params = [{transform_indices = @transform_0, window_bounds = array<i64: 8, 512>}, {transform_indices = @transform_1, window_bounds = array<i64: 8, 512>}, {transform_indices = @transform_2, window_bounds = array<i64: 8, 512>}]} {
    %c0 = arith.constant 0 : index
    %c0_0 = arith.constant 0 : index
    %0 = vector.load %arg1[%c0, %c0_0] : memref<8x512xf32, #tpu.memory_space<vmem>>, vector<8x512xf32>
    %c0_1 = arith.constant 0 : index
    %c0_2 = arith.constant 0 : index
    %1 = vector.load %arg2[%c0_1, %c0_2] : memref<8x512xf32, #tpu.memory_space<vmem>>, vector<8x512xf32>
    %2 = math.tanh %0 : vector<8x512xf32>
    %3 = arith.mulf %2, %1 : vector<8x512xf32>
    %4 = arith.addf %3, %0 : vector<8x512xf32>
    %c0_3 = arith.constant 0 : index
    %c0_4 = arith.constant 0 : index
    %5 = vector.load %arg3[%c0_3, %c0_4] : memref<8x512xf32, #tpu.memory_space<vmem>>, vector<8x512xf32>
    tpu.vector_store %arg3[%c0_3, %c0_4], %4 {strides = array<i32>} : memref<8x512xf32, #tpu.memory_space<vmem>>, vector<8x512xf32>,
    return
  }
  func.func @transform_0(%arg0: i32) -> (i32, i32) {
    %c0_i32 = arith.constant 0 : i32
    %c0_i32_0 = arith.constant 0 : i32
    return %arg0, %c0_i32 : i32, i32
  }
  func.func @transform_1(%arg0: i32) -> (i32, i32) {
    %c0_i32 = arith.constant 0 : i32
    %c0_i32_0 = arith.constant 0 : i32
    return %arg0, %c0_i32 : i32, i32
  }
  func.func @transform_2(%arg0: i32) -> (i32, i32) {
    %c0_i32 = arith.constant 0 : i32
    %c0_i32_0 = arith.constant 0 : i32
    return %arg0, %c0_i32 : i32, i32
  }
}

</mosaic_0001>

<bundles_post_ra>
// kernel: tpu_custom_call.1
= control target key start
LH: loop header
LB: loop body
LE: loop exit
PB: predicated region body
PF: predicated region fallthrough
CT: control target
= control target key end

     0   :  { %7 = vsyncpa [#allocation3], 0  ;;  %s180_s0 = inlined_call_operand.hbm [shape: f32[8,512], index: 0, kind: input, shape index: {}]   ;;  %s181_s1 = inlined_call_operand.hbm [shape: f32[8,512], index: 1, kind: input, shape index: {}]   ;;  %s182_s2 = inlined_call_operand.hbm [shape: f32[8,512], index: 2, kind: output, shape index: {}]  }
   0x1   :  { %8 = vsyncpa [#allocation6], 0 }
   0x2   :  { %9 = vsyncpa [#allocation4], 0  ;;  %s153_s9 = smov [#allocation2]   ;;  %s154_s11 = smov [#allocation5]  }
   0x3   :  { %s16_s10 = sshll.u32 %s153_s9, 4  ;;  %s26_s12 = sshll.u32 %s154_s11, 4  ;;  %s17_s10 = int_to_ptr.vmem [resolvable:$true] %s16_s10  ;;  %s27_s12 = int_to_ptr.vmem [resolvable:$true] %s26_s12 }
   0x4   :  { %s95_s13 = scalar_lea.vmem %s17_s10, 512  ;;  %p100_p1 = scmp.lt.s32.totalorder %s17_s10, %s17_s10 }
   0x5   :  { %p96_p0 = scmp.ne.s32.totalorder %s17_s10, %s95_s13  ;;  %p101_p2 = scmp.lt.s32.totalorder %s95_s13, %s95_s13 }
   0x7   :  { %p102_p3 = por %p101_p2, %p100_p1 }
   0x9   :  { %p103_p4 = pnand %p102_p3, %p96_p0 }
   0xb   :  { %106 = shalt.err (!%p103_p4)
}
   0xc   :  { %19 = dma.hbm_to_vmem [thread:$0]  %s180_s0, 512, %s17_s10, [#allocation3]  }
   0xd   :  { %s115_s16 = scalar_lea.vmem %s27_s12, 512  ;;  %p120_p6 = scmp.lt.s32.totalorder %s27_s12, %s27_s12 }
   0xe   :  { %p116_p5 = scmp.ne.s32.totalorder %s27_s12, %s115_s16  ;;  %p121_p7 = scmp.lt.s32.totalorder %s115_s16, %s115_s16 }
  0x10   :  { %p122_p8 = por %p121_p7, %p120_p6 }
  0x12   :  { %p123_p9 = pnand %p122_p8, %p116_p5 }
  0x14   :  { %126 = shalt.err (!%p123_p9)
}
  0x15   :  { %29 = dma.hbm_to_vmem [thread:$0]  %s181_s1, 512, %s27_s12, [#allocation6]  }
  0x16   :  { %147 = dma.done.wait [#allocation3], 512  }
  0x17   :  { %148 = vsyncadd [#allocation3], 4294966784 }
  0x18   :  { %149 = dma.done.wait [#allocation6], 512  }
  0x19   :  { %150 = vsyncadd [#allocation6], 4294966784  ;;  %v36_v0 = vld [vmem:[#allocation2] sm:$0xff]  ;;  %v37_v1 = vld [vmem:[#allocation2 + $0x8] sm:$0xff]  ;;  %s155_s0 = smov [#allocation7]  }
  0x1a   :  { %79 = vtanh.f32 %v36_v0  ;;  %v38_v2 = vld [vmem:[#allocation2 + $0x10] sm:$0xff]  ;;  %v39_v3 = vld [vmem:[#allocation2 + $0x18] sm:$0xff]  ;;  %v40_v4 = vld [vmem:[#allocation5] sm:$0xff]  ;;  %s66_s1 = sshll.u32 %s155_s0, 4  ;;  %s67_s1 = int_to_ptr.vmem [resolvable:$true] %s66_s1 }
  0x1b   :  { %81 = vtanh.f32 %v37_v1  ;;  %v41_v5 = vld [vmem:[#allocation5 + $0x8] sm:$0xff]  ;;  %v42_v7 = vld [vmem:[#allocation5 + $0x10] sm:$0xff]  ;;  %v43_v10 = vld [vmem:[#allocation5 + $0x18] sm:$0xff]  ;;  %s127_s19 = scalar_lea.vmem %s67_s1, 512  ;;  %p132_p11 = scmp.lt.s32.totalorder %s67_s1, %s67_s1 }
  0x1c   :  { %83 = vtanh.f32 %v38_v2  ;;  %p128_p10 = scmp.ne.s32.totalorder %s67_s1, %s127_s19  ;;  %p133_p12 = scmp.lt.s32.totalorder %s127_s19, %s127_s19 }
  0x1d   :  { %85 = vtanh.f32 %v39_v3 }
  0x1e   :  { %p134_p13 = por %p133_p12, %p132_p11 }
  0x20   :  { %p135_p0 = pnand %p134_p13, %p128_p10 }
  0x27   :  { %v80_v6 = vpop.eup %79 }
  0x28   :  { %v82_v8 = vpop.eup %81  ;;  %v48_v9 = vmul.f32 %v80_v6, %v40_v4 }
  0x29   :  { %v84_v11 = vpop.eup %83  ;;  %v49_v12 = vmul.f32 %v82_v8, %v41_v5 }
  0x2a   :  { %v86_v13 = vpop.eup %85  ;;  %v52_v14 = vadd.f32 %v48_v9, %v36_v0  ;;  %v50_v15 = vmul.f32 %v84_v11, %v42_v7 }
  0x2b   :  { %v53_v16 = vadd.f32 %v49_v12, %v37_v1  ;;  %v51_v17 = vmul.f32 %v86_v13, %v43_v10 }
  0x2c   :  { %56 = vst [vmem:[#allocation7] sm:$0xff] %v52_v14  ;;  %v54_v18 = vadd.f32 %v50_v15, %v38_v2 }
  0x2d   :  { %57 = vst [vmem:[#allocation7 + $0x8] sm:$0xff] %v53_v16  ;;  %v55_v19 = vadd.f32 %v51_v17, %v39_v3 }
  0x2e   :  { %58 = vst [vmem:[#allocation7 + $0x10] sm:$0xff] %v54_v18 }
  0x2f   :  { %59 = vst [vmem:[#allocation7 + $0x18] sm:$0xff] %v55_v19 }
  0x30   :  { %138 = shalt.err (!%p135_p0)
}
  0x31   :  { %69 = dma.vmem_to_hbm [thread:$0]  %s67_s1, 512, %s182_s2, [#allocation4]  }
  0x32   :  { %151 = dma.done.wait [#allocation4], 512  }
  0x33   :  { %152 = vsyncadd [#allocation4], 4294966784 }
  0x34   :  { %73 = vsyncpa [#allocation3], 1 }
  0x35   :  { %74 = vsyncpa [#allocation6], 1 }
  0x36   :  { %75 = vsyncpa [#allocation4], 1 }

</bundles_post_ra>
